<compile_context>
chip_gen: v6e
topology: v6e:2x2x1
jax: 0.10.0
libtpu: 0.0.40
codegen_flags: <defaults>
</compile_context>

<pallas_src>
import jax
import jax.numpy as jnp
from jax.experimental import pallas as pl
from jax.experimental.pallas import tpu as pltpu

NUM_SUITS = 4            # len(SUITS)
NUM_RANKS = 13           # len(RANKS)
EMB_DIM = 32             # embedding_dim
N_CARDS = 2              # hole cards per hand in the example

LANE = 128               # lane-dense padding target
SUIT_OFF = 0
RANK_OFF = NUM_SUITS + 1                              # 5
CARD_OFF = RANK_OFF + NUM_RANKS + 1                   # 19
FUSED_VOCAB = CARD_OFF + NUM_SUITS * NUM_RANKS + 1    # 72
POT_LANE = FUSED_VOCAB                                # 72
CR_LANE = FUSED_VOCAB + 1                             # 73
ONE_LANE = FUSED_VOCAB + 2                            # 74 (bias lane, value 1)
OUT_LANES = 8            # narrow output writeback (3 real logits, padded to 8)


# --------------------------------------------------------------------------- #
# Kernel
# --------------------------------------------------------------------------- #
def policy_kernel(idx_ref, pc_ref, m_ref, w2_ref, b2_ref, w3_ref, b3_ref,
                  out_ref):
    bt = idx_ref.shape[0]           # batch tile
    n_idx = idx_ref.shape[1]        # 3 * N_CARDS fused-table indices per hand
    vocab = m_ref.shape[0]          # 128 (padded fused vocab + pot/cr/bias)

    # --- multi-hot over fused indices (int32 accumulate, one convert) -------
    lane = jax.lax.broadcasted_iota(jnp.int32, (bt, vocab), 1)      # (bt, 128)
    idx = idx_ref[...]                                              # (bt, n_idx)
    counts = jnp.zeros((bt, vocab), jnp.int32)
    for j in range(n_idx):                                          # static unroll
        counts = counts + (lane == idx[:, j:j + 1]).astype(jnp.int32)
    mh = counts.astype(jnp.float32)

    # pot -> lane 72, canRaise -> lane 73, bias constant 1.0 -> lane 74
    mh = jnp.where(lane == POT_LANE, pc_ref[:, 0:1], mh)
    mh = jnp.where(lane == CR_LANE, pc_ref[:, 1:2], mh)
    mh = jnp.where(lane == ONE_LANE, 1.0, mh)

    # --- fused (embedding-sum + fc1 + b1) as ONE matmul, then ReLU ----------
    x = jnp.dot(mh, m_ref[...], preferred_element_type=jnp.float32)
    x = jnp.maximum(x, 0.0)

    # --- fc2 + sigmoid -------------------------------------------------------
    x = jnp.dot(x, w2_ref[...], preferred_element_type=jnp.float32) + b2_ref[...]
    x = jax.nn.sigmoid(x)

    # --- fc3 + sigmoid -------------------------------------------------------
    x = jnp.dot(x, w3_ref[...], preferred_element_type=jnp.float32) + b3_ref[...]
    x = jax.nn.sigmoid(x)

    # --- normalize over the 3 real logits, narrow (bt, 8) writeback ---------
    out_lane = jax.lax.broadcasted_iota(jnp.int32, x.shape, 1)
    denom = jnp.sum(jnp.where(out_lane < 3, x, 0.0), axis=1, keepdims=True)
    probs = x * pl.reciprocal(denom, approx=False)
    out_ref[...] = probs[:, :OUT_LANES]


# --------------------------------------------------------------------------- #
# Wrappers
# --------------------------------------------------------------------------- #
def policy_net_forward_batched(suits, ranks, card_ids, pots, can_raise,
                               kparams, *, block_b=1024):
    """Batched forward.  suits/ranks/card_ids: (B, N_CARDS) int; pots /
    can_raise: (B,) float.  Returns (B, 3) normalized action probabilities."""
    suits = jnp.asarray(suits, jnp.int32)
    ranks = jnp.asarray(ranks, jnp.int32)
    card_ids = jnp.asarray(card_ids, jnp.int32)
    pots = jnp.asarray(pots, jnp.float32)
    can_raise = jnp.asarray(can_raise, jnp.float32)

    b = suits.shape[0]
    # Tile size: multiple of 8, but never pad a tiny batch up to a huge tile.
    block_b = max(8, 8 * (int(block_b) // 8))
    block_b = min(block_b, 8 * pl.cdiv(b, 8))
    b_pad = block_b * pl.cdiv(b, block_b)

    # Fused-table indices: [suit_0.., rank_0+5.., card_0+19..]  -> (B, 3*N_CARDS)
    idx = jnp.concatenate(
        [suits + SUIT_OFF, ranks + RANK_OFF, card_ids + CARD_OFF], axis=1)
    n_idx = idx.shape[1]

    # Tiny (B, 2) pot/canRaise stream (scattered into lanes 72/73 in-kernel).
    pc = jnp.stack([pots, can_raise], axis=1)

    if b_pad != b:
        idx = jnp.pad(idx, ((0, b_pad - b), (0, 0)))
        pc = jnp.pad(pc, ((0, b_pad - b), (0, 0)))

    def weight_spec(arr):
        return pl.BlockSpec(arr.shape, lambda i: (0, 0))

    out = pl.pallas_call(
        policy_kernel,
        out_shape=jax.ShapeDtypeStruct((b_pad, OUT_LANES), jnp.float32),
        grid=(b_pad // block_b,),
        in_specs=[
            pl.BlockSpec((block_b, n_idx), lambda i: (i, 0)),
            pl.BlockSpec((block_b, 2), lambda i: (i, 0)),
            weight_spec(kparams["m"]),
            weight_spec(kparams["w2"]), weight_spec(kparams["b2"]),
            weight_spec(kparams["w3"]), weight_spec(kparams["b3"]),
        ],
        out_specs=pl.BlockSpec((block_b, OUT_LANES), lambda i: (i, 0)),
        compiler_params=pltpu.CompilerParams(
            # v7x: shard batch tiles across the 2 TensorCores (needs >=2 tiles,
            # which the default block_b=1024 gives for any large batch).
            dimension_semantics=("parallel",),
            # v5e's scoped-VMEM default is 16 MiB; keep large tiles compiling.
            vmem_limit_bytes=32 * 1024 * 1024),
    )(idx, pc, kparams["m"], kparams["w2"], kparams["b2"],
      kparams["w3"], kparams["b3"])

    return out[:b, :3]


def policy_net_forward(suits, ranks, card_ids, pot, can_raise, kparams):
    """Single-hand forward matching PolicyNet.forward(suits, ranks, card_ids,
    pot, canRaise).  Internally padded up to one batch tile."""
    suits = jnp.asarray(suits, jnp.int32).reshape(1, -1)
    ranks = jnp.asarray(ranks, jnp.int32).reshape(1, -1)
    card_ids = jnp.asarray(card_ids, jnp.int32).reshape(1, -1)
    pots = jnp.asarray([pot], jnp.float32)
    crs = jnp.asarray([can_raise], jnp.float32)
    return policy_net_forward_batched(suits, ranks, card_ids, pots, crs,
                                      kparams, block_b=8)[0]


# --------------------------------------------------------------------------- #
# Parameters
# --------------------------------------------------------------------------- #
def init_params(key):
    """Raw parameters mimicking the PyTorch module's shapes/layout."""
    ks = jax.random.split(key, 6)

    def linear(k, fan_in, fan_out):
        kw, kb = jax.random.split(k)
        bound = 1.0 / jnp.sqrt(jnp.float32(fan_in))
        w = jax.random.uniform(kw, (fan_out, fan_in), jnp.float32, -bound, bound)
        b = jax.random.uniform(kb, (fan_out,), jnp.float32, -bound, bound)
        return w, b

    suit_tab = jax.random.normal(ks[0], (NUM_SUITS + 1, EMB_DIM), jnp.float32)
    rank_tab = jax.random.normal(ks[1], (NUM_RANKS + 1, EMB_DIM), jnp.float32)
    card_tab = jax.random.normal(ks[2], (NUM_SUITS * NUM_RANKS + 1, EMB_DIM),
                                 jnp.float32)
    w1, b1 = linear(ks[3], EMB_DIM + 2, 32)   # fc1: (32, 34)
    w2, b2 = linear(ks[4], 32, 16)            # fc2: (16, 32)
    w3, b3 = linear(ks[5], 16, 3)             # fc3: (3, 16)
    return dict(suit_tab=suit_tab, rank_tab=rank_tab, card_tab=card_tab,
                w1=w1, b1=b1, w2=w2, b2=b2, w3=w3, b3=b3)


def prepare_kernel_params(p):
    """Fused / pre-multiplied / lane-padded (to 128) parameters.

    M folds the embedding tables, W1 and b1 into one (128, 128) matrix:
      rows 0..71  : fused_table @ W1[:, :32].T   (embedding part of fc1)
      row  72     : W1 column for pot
      row  73     : W1 column for canRaise
      row  74     : b1                            (bias lane, multi-hot = 1.0)
    """
    fused = jnp.concatenate([p["suit_tab"], p["rank_tab"], p["card_tab"]],
                            axis=0)                                  # (72, 32)
    w1t = p["w1"].T                                                  # (34, 32)
    m_emb = fused @ w1t[:EMB_DIM]                                    # (72, 32)
    m = jnp.zeros((LANE, LANE), jnp.float32)
    m = m.at[:FUSED_VOCAB, :32].set(m_emb)
    m = m.at[POT_LANE, :32].set(w1t[EMB_DIM])
    m = m.at[CR_LANE, :32].set(w1t[EMB_DIM + 1])
    m = m.at[ONE_LANE, :32].set(p["b1"])

    w2 = jnp.zeros((LANE, LANE), jnp.float32).at[:32, :16].set(p["w2"].T)
    b2 = jnp.zeros((1, LANE), jnp.float32).at[:, :16].set(p["b2"])
    w3 = jnp.zeros((LANE, LANE), jnp.float32).at[:16, :3].set(p["w3"].T)
    b3 = jnp.zeros((1, LANE), jnp.float32).at[:, :3].set(p["b3"])
    return dict(m=m, w2=w2, b2=b2, w3=w3, b3=b3)


# --------------------------------------------------------------------------- #
# Pure-JAX reference (matches the PyTorch forward)
# --------------------------------------------------------------------------- #
def policy_net_reference(suits, ranks, card_ids, pot, can_raise, params):
    s = jnp.asarray(suits, jnp.int32)
    r = jnp.asarray(ranks, jnp.int32)
    c = jnp.asarray(card_ids, jnp.int32)
    emb = params["suit_tab"][s] + params["rank_tab"][r] + params["card_tab"][c]
    hand = jnp.sum(emb, axis=0)                                      # (32,)
    extra = jnp.stack([jnp.asarray(pot, jnp.float32),
                       jnp.asarray(can_raise, jnp.float32)])
    x = jnp.concatenate([hand, extra])                               # (34,)
    x = jnp.maximum(x @ params["w1"].T + params["b1"], 0.0)
    x = jax.nn.sigmoid(x @ params["w2"].T + params["b2"])
    x = jax.nn.sigmoid(x @ params["w3"].T + params["b3"])
    return x / jnp.sum(x)


# --------------------------------------------------------------------------- #
if __name__ == "__main__":
    key = jax.random.PRNGKey(0)
    pkey, dkey = jax.random.split(key)

    params = init_params(pkey)
    kparams = prepare_kernel_params(params)

    # Small deterministic batch: 16 hands of 2 cards, tiled as 2 grid steps of 8.
    B = 16
    k1, k2, k3, k4 = jax.random.split(dkey, 4)
    suits = jax.random.randint(k1, (B, N_CARDS), 0, NUM_SUITS)
    ranks = jax.random.randint(k2, (B, N_CARDS), 0, NUM_RANKS)
    card_ids = suits * NUM_RANKS + ranks
    pots = jax.random.uniform(k3, (B,), jnp.float32, 0.0, 100.0)
    can_raise = jax.random.randint(k4, (B,), 0, 2).astype(jnp.float32)

    out = policy_net_forward_batched(suits, ranks, card_ids, pots, can_raise,
                                     kparams, block_b=8)
    out = jax.block_until_ready(out)

    ref = jax.vmap(
        lambda s, r, c, p, cr: policy_net_reference(s, r, c, p, cr, params)
    )(suits, ranks, card_ids, pots, can_raise)

    assert out.shape == (B, 3)
    assert jnp.allclose(out, ref, atol=1e-5, rtol=1e-5), (out, ref)
    assert jnp.allclose(jnp.sum(out, axis=1), 1.0, atol=1e-5)

    # Single-hand path matching the original PyTorch forward signature.
    single = policy_net_forward([0, 2], [5, 11],
                                [0 * NUM_RANKS + 5, 2 * NUM_RANKS + 11],
                                10.0, 1.0, kparams)
    single = jax.block_until_ready(single)
    single_ref = policy_net_reference([0, 2], [5, 11],
                                      [0 * NUM_RANKS + 5, 2 * NUM_RANKS + 11],
                                      10.0, 1.0, params)
    assert jnp.allclose(single, single_ref, atol=1e-5, rtol=1e-5), (single, single_ref)

    print("KERNEL_OK")
</pallas_src>

<mosaic_0001>
module attributes {stable_mosaic.version = 11 : i64} {
  func.func @policy_kernel(%arg0: i32, %arg1: memref<8x6xi32, #tpu.memory_space<vmem>>, %arg2: memref<8x2xf32, #tpu.memory_space<vmem>>, %arg3: memref<128x128xf32, #tpu.memory_space<vmem>>, %arg4: memref<128x128xf32, #tpu.memory_space<vmem>>, %arg5: memref<1x128xf32, #tpu.memory_space<vmem>>, %arg6: memref<128x128xf32, #tpu.memory_space<vmem>>, %arg7: memref<1x128xf32, #tpu.memory_space<vmem>>, %arg8: memref<8x8xf32, #tpu.memory_space<vmem>>) attributes {dimension_semantics = [#tpu.dimension_semantics<parallel>], iteration_bounds = array<i64: 2>, scalar_prefetch = 0 : i64, scratch_operands = 0 : i64, tpu.core_type = #tpu.core_type<tc>, window_params = [{transform_indices = @transform_0, window_bounds = array<i64: 8, 6>}, {transform_indices = @transform_1, window_bounds = array<i64: 8, 2>}, {pipeline_mode = #tpu.pipeline_mode<synchronous>, transform_indices = @transform_2, window_bounds = array<i64: 128, 128>}, {pipeline_mode = #tpu.pipeline_mode<synchronous>, transform_indices = @transform_3, window_bounds = array<i64: 128, 128>}, {pipeline_mode = #tpu.pipeline_mode<synchronous>, transform_indices = @transform_4, window_bounds = array<i64: 1, 128>}, {pipeline_mode = #tpu.pipeline_mode<synchronous>, transform_indices = @transform_5, window_bounds = array<i64: 128, 128>}, {pipeline_mode = #tpu.pipeline_mode<synchronous>, transform_indices = @transform_6, window_bounds = array<i64: 1, 128>}, {transform_indices = @transform_7, window_bounds = array<i64: 8, 8>}]} {
    %0 = tpu.iota {dimensions = array<i32: 1>} : vector<8x128xi32>
    %c0 = arith.constant 0 : index
    %c0_0 = arith.constant 0 : index
    %1 = vector.load %arg1[%c0, %c0_0] : memref<8x6xi32, #tpu.memory_space<vmem>>, vector<8x6xi32>
    %c0_i32 = arith.constant 0 : i32
    %2 = vector.broadcast %c0_i32 : i32 to vector<8x128xi32>
    %3 = vector.extract_strided_slice %1 {offsets = [0, 0], sizes = [8, 1], strides = [1, 1]} : vector<8x6xi32> to vector<8x1xi32>
    %4 = vector.broadcast %3 : vector<8x1xi32> to vector<8x128xi32>
    %5 = arith.cmpi eq, %0, %4 : vector<8x128xi32>
    %6 = arith.extui %5 : vector<8x128xi1> to vector<8x128xi32>
    %7 = arith.addi %2, %6 : vector<8x128xi32>
    %8 = vector.extract_strided_slice %1 {offsets = [0, 1], sizes = [8, 1], strides = [1, 1]} : vector<8x6xi32> to vector<8x1xi32>
    %9 = vector.broadcast %8 : vector<8x1xi32> to vector<8x128xi32>
    %10 = arith.cmpi eq, %0, %9 : vector<8x128xi32>
    %11 = arith.extui %10 : vector<8x128xi1> to vector<8x128xi32>
    %12 = arith.addi %7, %11 : vector<8x128xi32>
    %13 = vector.extract_strided_slice %1 {offsets = [0, 2], sizes = [8, 1], strides = [1, 1]} : vector<8x6xi32> to vector<8x1xi32>
    %14 = vector.broadcast %13 : vector<8x1xi32> to vector<8x128xi32>
    %15 = arith.cmpi eq, %0, %14 : vector<8x128xi32>
    %16 = arith.extui %15 : vector<8x128xi1> to vector<8x128xi32>
    %17 = arith.addi %12, %16 : vector<8x128xi32>
    %18 = vector.extract_strided_slice %1 {offsets = [0, 3], sizes = [8, 1], strides = [1, 1]} : vector<8x6xi32> to vector<8x1xi32>
    %19 = vector.broadcast %18 : vector<8x1xi32> to vector<8x128xi32>
    %20 = arith.cmpi eq, %0, %19 : vector<8x128xi32>
    %21 = arith.extui %20 : vector<8x128xi1> to vector<8x128xi32>
    %22 = arith.addi %17, %21 : vector<8x128xi32>
    %23 = vector.extract_strided_slice %1 {offsets = [0, 4], sizes = [8, 1], strides = [1, 1]} : vector<8x6xi32> to vector<8x1xi32>
    %24 = vector.broadcast %23 : vector<8x1xi32> to vector<8x128xi32>
    %25 = arith.cmpi eq, %0, %24 : vector<8x128xi32>
    %26 = arith.extui %25 : vector<8x128xi1> to vector<8x128xi32>
    %27 = arith.addi %22, %26 : vector<8x128xi32>
    %28 = vector.extract_strided_slice %1 {offsets = [0, 5], sizes = [8, 1], strides = [1, 1]} : vector<8x6xi32> to vector<8x1xi32>
    %29 = vector.broadcast %28 : vector<8x1xi32> to vector<8x128xi32>
    %30 = arith.cmpi eq, %0, %29 : vector<8x128xi32>
    %31 = arith.extui %30 : vector<8x128xi1> to vector<8x128xi32>
    %32 = arith.addi %27, %31 : vector<8x128xi32>
    %33 = arith.sitofp %32 : vector<8x128xi32> to vector<8x128xf32>
    %c72_i32 = arith.constant 72 : i32
    %34 = vector.broadcast %c72_i32 : i32 to vector<8x128xi32>
    %35 = arith.cmpi eq, %0, %34 : vector<8x128xi32>
    %c0_1 = arith.constant 0 : index
    %c0_2 = arith.constant 0 : index
    %36 = vector.load %arg2[%c0_1, %c0_2] : memref<8x2xf32, #tpu.memory_space<vmem>>, vector<8x1xf32>
    %37 = vector.shape_cast %36 : vector<8x1xf32> to vector<8x1xf32>
    %38 = vector.broadcast %37 : vector<8x1xf32> to vector<8x128xf32>
    %39 = arith.select %35, %38, %33 : vector<8x128xi1>, vector<8x128xf32>
    %c73_i32 = arith.constant 73 : i32
    %40 = vector.broadcast %c73_i32 : i32 to vector<8x128xi32>
    %41 = arith.cmpi eq, %0, %40 : vector<8x128xi32>
    %c0_3 = arith.constant 0 : index
    %c1 = arith.constant 1 : index
    %42 = vector.load %arg2[%c0_3, %c1] : memref<8x2xf32, #tpu.memory_space<vmem>>, vector<8x1xf32>
    %43 = vector.shape_cast %42 : vector<8x1xf32> to vector<8x1xf32>
    %44 = vector.broadcast %43 : vector<8x1xf32> to vector<8x128xf32>
    %45 = arith.select %41, %44, %39 : vector<8x128xi1>, vector<8x128xf32>
    %c74_i32 = arith.constant 74 : i32
    %46 = vector.broadcast %c74_i32 : i32 to vector<8x128xi32>
    %47 = arith.cmpi eq, %0, %46 : vector<8x128xi32>
    %cst = arith.constant 1.000000e+00 : f32
    %48 = vector.broadcast %cst : f32 to vector<8x128xf32>
    %49 = arith.select %47, %48, %45 : vector<8x128xi1>, vector<8x128xf32>
    %c0_4 = arith.constant 0 : index
    %c0_5 = arith.constant 0 : index
    %50 = vector.load %arg3[%c0_4, %c0_5] : memref<128x128xf32, #tpu.memory_space<vmem>>, vector<128x128xf32>
    %cst_6 = arith.constant dense<0.000000e+00> : vector<8x128xf32>
    %51 = tpu.matmul %49, %50, %cst_6 {dimension_numbers = #tpu.dot_dimension_numbers<[1], [0], [0], [1], [0, 0, 1, 1], [], []>} : vector<8x128xf32>, vector<128x128xf32>, vector<8x128xf32> -> vector<8x128xf32>
    %cst_7 = arith.constant 0.000000e+00 : f32
    %52 = vector.broadcast %cst_7 : f32 to vector<8x128xf32>
    %53 = arith.maximumf %51, %52 : vector<8x128xf32>
    %c0_8 = arith.constant 0 : index
    %c0_9 = arith.constant 0 : index
    %54 = vector.load %arg4[%c0_8, %c0_9] : memref<128x128xf32, #tpu.memory_space<vmem>>, vector<128x128xf32>
    %cst_10 = arith.constant dense<0.000000e+00> : vector<8x128xf32>
    %55 = tpu.matmul %53, %54, %cst_10 {dimension_numbers = #tpu.dot_dimension_numbers<[1], [0], [0], [1], [0, 0, 1, 1], [], []>} : vector<8x128xf32>, vector<128x128xf32>, vector<8x128xf32> -> vector<8x128xf32>
    %c0_11 = arith.constant 0 : index
    %c0_12 = arith.constant 0 : index
    %56 = vector.load %arg5[%c0_11, %c0_12] : memref<1x128xf32, #tpu.memory_space<vmem>>, vector<1x128xf32>
    %57 = vector.broadcast %56 : vector<1x128xf32> to vector<8x128xf32>
    %58 = arith.addf %55, %57 : vector<8x128xf32>
    %59 = arith.negf %58 : vector<8x128xf32>
    %60 = math.exp %59 : vector<8x128xf32>
    %cst_13 = arith.constant 1.000000e+00 : f32
    %61 = vector.broadcast %cst_13 : f32 to vector<8x128xf32>
    %62 = arith.addf %61, %60 : vector<8x128xf32>
    %63 = arith.divf %61, %62 : vector<8x128xf32>
    %c0_14 = arith.constant 0 : index
    %c0_15 = arith.constant 0 : index
    %64 = vector.load %arg6[%c0_14, %c0_15] : memref<128x128xf32, #tpu.memory_space<vmem>>, vector<128x128xf32>
    %cst_16 = arith.constant dense<0.000000e+00> : vector<8x128xf32>
    %65 = tpu.matmul %63, %64, %cst_16 {dimension_numbers = #tpu.dot_dimension_numbers<[1], [0], [0], [1], [0, 0, 1, 1], [], []>} : vector<8x128xf32>, vector<128x128xf32>, vector<8x128xf32> -> vector<8x128xf32>
    %c0_17 = arith.constant 0 : index
    %c0_18 = arith.constant 0 : index
    %66 = vector.load %arg7[%c0_17, %c0_18] : memref<1x128xf32, #tpu.memory_space<vmem>>, vector<1x128xf32>
    %67 = vector.broadcast %66 : vector<1x128xf32> to vector<8x128xf32>
    %68 = arith.addf %65, %67 : vector<8x128xf32>
    %69 = arith.negf %68 : vector<8x128xf32>
    %70 = math.exp %69 : vector<8x128xf32>
    %cst_19 = arith.constant 1.000000e+00 : f32
    %71 = vector.broadcast %cst_19 : f32 to vector<8x128xf32>
    %72 = arith.addf %71, %70 : vector<8x128xf32>
    %73 = arith.divf %71, %72 : vector<8x128xf32>
    %74 = tpu.iota {dimensions = array<i32: 1>} : vector<8x128xi32>
    %c3_i32 = arith.constant 3 : i32
    %75 = vector.broadcast %c3_i32 : i32 to vector<8x128xi32>
    %76 = arith.cmpi slt, %74, %75 : vector<8x128xi32>
    %cst_20 = arith.constant 0.000000e+00 : f32
    %77 = vector.broadcast %cst_20 : f32 to vector<8x128xf32>
    %78 = arith.select %76, %73, %77 : vector<8x128xi1>, vector<8x128xf32>
    %cst_21 = arith.constant dense<0.000000e+00> : vector<8xf32>
    %79 = vector.multi_reduction <add>, %78, %cst_21 [1] : vector<8x128xf32> to vector<8xf32>
    %80 = vector.shape_cast %79 : vector<8xf32> to vector<8x1xf32>
    %81 = tpu.reciprocal %80 : vector<8x1xf32> -> vector<8x1xf32>
    %82 = vector.broadcast %81 : vector<8x1xf32> to vector<8x128xf32>
    %83 = arith.mulf %73, %82 : vector<8x128xf32>
    %84 = vector.extract_strided_slice %83 {offsets = [0, 0], sizes = [8, 8], strides = [1, 1]} : vector<8x128xf32> to vector<8x8xf32>
    %c0_22 = arith.constant 0 : index
    %c0_23 = arith.constant 0 : index
    %85 = vector.load %arg8[%c0_22, %c0_23] : memref<8x8xf32, #tpu.memory_space<vmem>>, vector<8x8xf32>
    tpu.vector_store %arg8[%c0_22, %c0_23], %84 {strides = array<i32>} : memref<8x8xf32, #tpu.memory_space<vmem>>, vector<8x8xf32>,
    return
  }
  func.func @transform_0(%arg0: i32) -> (i32, i32) {
    %c0_i32 = arith.constant 0 : i32
    %c0_i32_0 = arith.constant 0 : i32
    return %arg0, %c0_i32 : i32, i32
  }
  func.func @transform_1(%arg0: i32) -> (i32, i32) {
    %c0_i32 = arith.constant 0 : i32
    %c0_i32_0 = arith.constant 0 : i32
    return %arg0, %c0_i32 : i32, i32
  }
  func.func @transform_2(%arg0: i32) -> (i32, i32) {
    %c0_i32 = arith.constant 0 : i32
    %c0_i32_0 = arith.constant 0 : i32
    %c0_i32_1 = arith.constant 0 : i32
    return %c0_i32, %c0_i32_0 : i32, i32
  }
  func.func @transform_3(%arg0: i32) -> (i32, i32) {
    %c0_i32 = arith.constant 0 : i32
    %c0_i32_0 = arith.constant 0 : i32
    %c0_i32_1 = arith.constant 0 : i32
    return %c0_i32, %c0_i32_0 : i32, i32
  }
  func.func @transform_4(%arg0: i32) -> (i32, i32) {
    %c0_i32 = arith.constant 0 : i32
    %c0_i32_0 = arith.constant 0 : i32
    %c0_i32_1 = arith.constant 0 : i32
    return %c0_i32, %c0_i32_0 : i32, i32
  }
  func.func @transform_5(%arg0: i32) -> (i32, i32) {
    %c0_i32 = arith.constant 0 : i32
    %c0_i32_0 = arith.constant 0 : i32
    %c0_i32_1 = arith.constant 0 : i32
    return %c0_i32, %c0_i32_0 : i32, i32
  }
  func.func @transform_6(%arg0: i32) -> (i32, i32) {
    %c0_i32 = arith.constant 0 : i32
    %c0_i32_0 = arith.constant 0 : i32
    %c0_i32_1 = arith.constant 0 : i32
    return %c0_i32, %c0_i32_0 : i32, i32
  }
  func.func @transform_7(%arg0: i32) -> (i32, i32) {
    %c0_i32 = arith.constant 0 : i32
    %c0_i32_0 = arith.constant 0 : i32
    return %arg0, %c0_i32 : i32, i32
  }
}

</mosaic_0001>

<bundles_post_ra>
// kernel: tpu_custom_call.1
= control target key start
LH: loop header
LB: loop body
LE: loop exit
PB: predicated region body
PF: predicated region fallthrough
CT: control target
= control target key end

     0   :  { %12 = vsyncpa [#allocation3], 0  ;;  %s1335_s0 = inlined_call_operand.vmem [shape: s32[16,6], index: 0, kind: input, shape index: {}]   ;;  %s1336_s1 = inlined_call_operand.vmem [shape: f32[16,2], index: 1, kind: input, shape index: {}]   ;;  %s1337_s2 = inlined_call_operand.hbm [shape: f32[128,128], index: 2, kind: input, shape index: {}]   ;;  %s1338_s3 = inlined_call_operand.hbm [shape: f32[128,128], index: 3, kind: input, shape index: {}]   ;;  %s1339_s4 = inlined_call_operand.vmem [shape: f32[1,128], index: 4, kind: input, shape index: {}]   ;;  %s1340_s5 = inlined_call_operand.hbm [shape: f32[128,128], index: 5, kind: input, shape index: {}]   ;;  %s1341_s6 = inlined_call_operand.vmem [shape: f32[1,128], index: 6, kind: input, shape index: {}]   ;;  %s1342_s7 = inlined_call_operand.vmem [shape: f32[16,8], index: 7, kind: output, shape index: {}]  }
   0x1   :  { %13 = vsyncpa [#allocation5], 0  ;;  %s1170_s24 = smov 0  }
   0x2 LB: > { %s1176_s25 = sadd.s32 4294967295, %s1115_s24   ;;  %p781_p0 = scmp.ge.s32.totalorder %s1115_s24, 1  ;;  %s1115_s24 = sphi %s1170_s24, %s19_s24  }
   0x3   : > { %p207_p1 = scmp.lt.s32.totalorder %s1115_s24, 3  ;;  %p977_p2 = scmp.eq.s32.totalorder %s1176_s25, 0 }
   0x4   : > { %s1117_s27 = smov [#allocation4]   ;;  %s1118_s29 = smov [#allocation2]  }
   0x5   : > { %p1181_p3 = pnand %p781_p0, %p207_p1  ;;  %s232_s28 = sshll.u32 %s1117_s27, 4  ;;  %s233_s28 = int_to_ptr.vmem [resolvable:$true] %s232_s28 }
   0x6   : > { %s219_s30 = sshll.u32 %s1118_s29, 4  ;;  %s1119_s9 = smov [#allocation6]   ;;  %s220_s30 = int_to_ptr.vmem [resolvable:$true] %s219_s30 }
   0x7   : > { %p967_p4 = pneg %p1181_p3  ;;  %s248_s10 = sshll.u32 %s1119_s9, 4  ;;  %s1193_s10 = int_to_ptr.vmem [resolvable:$true] %s248_s10 }
   0x8   : > { %s1034_s11 = scalar_lea.vmem %s233_s28, 2048  ;;  %p1042_p10 = scmp.lt.s32.totalorder %s233_s28, %s233_s28 }
   0x9   : > { %p1189_p5 = pnand %p977_p2, %p967_p4  ;;  %p1035_p7 = scmp.ne.s32.totalorder %s233_s28, %s1034_s11 }
   0xa   : > { %p1043_p11 = scmp.lt.s32.totalorder %s1034_s11, %s1034_s11 }
   0xb   : > { %p1025_p6 = pneg %p1189_p5 }
   0xc   : > { %p1044_p12 = por %p1043_p11, %p1042_p10 }
   0xd   : > { %p1037_p8 = pnand %p1035_p7, %p1025_p6 }
   0xf   : > { %p1038_p9 = pneg %p1037_p8 }
  0x11   : > { %p1045_p13 = pnand %p1044_p12, %p1038_p9 }
  0x13   : > { %1048 = shalt.err (!%p1045_p13)
}
  0x14   : > { %s1120_s12 = smov 128   ;;  %s1121_s13 = smov 8  }
  0x15   : > { %973 = dma.hbm_to_vmem [thread:$0]  (!%p1189_p5), %s1338_s3, 2048, %s233_s28, [#allocation5], %s1120_s12, %s1120_s12, %s1121_s13  }
  0x16   : > { %s1060_s16 = scalar_lea.vmem %s220_s30, 2048  ;;  %p1068_p7 = scmp.lt.s32.totalorder %s220_s30, %s220_s30 }
  0x17   : > { %p1061_p0 = scmp.ne.s32.totalorder %s220_s30, %s1060_s16  ;;  %p1069_p8 = scmp.lt.s32.totalorder %s1060_s16, %s1060_s16 }
  0x19   : > { %p1063_p1 = pnand %p1061_p0, %p1025_p6  ;;  %p1070_p10 = por %p1069_p8, %p1068_p7 }
  0x1b   : > { %p1064_p4 = pneg %p1063_p1 }
  0x1d   : > { %p1071_p9 = pnand %p1070_p10, %p1064_p4 }
  0x1f   : > { %1074 = shalt.err (!%p1071_p9)
}
  0x20   : > { %970 = dma.hbm_to_vmem [thread:$0]  (!%p1189_p5), %s1337_s2, 2048, %s220_s30, [#allocation3], %s1120_s12, %s1120_s12, %s1121_s13  }
  0x21   : > { %s1086_s19 = scalar_lea.vmem %s1193_s10, 2048  ;;  %p1094_p0 = scmp.lt.s32.totalorder %s1193_s10, %s1193_s10 }
  0x22   : > { %p1087_p11 = scmp.ne.s32.totalorder %s1193_s10, %s1086_s19  ;;  %p1095_p1 = scmp.lt.s32.totalorder %s1086_s19, %s1086_s19 }
  0x24   : > { %p1089_p12 = pnand %p1087_p11, %p1025_p6  ;;  %p1096_p4 = por %p1095_p1, %p1094_p0 }
  0x26   : > { %p1090_p13 = pneg %p1089_p12 }
  0x28   : > { %p1097_p7 = pnand %p1096_p4, %p1090_p13 }
  0x2a   : > { %1100 = shalt.err (!%p1097_p7)
}
  0x2b   : > { %976 = dma.hbm_to_vmem [thread:$0]  (!%p1189_p5), %s1340_s5, 2048, %s1193_s10, [#allocation5], %s1120_s12, %s1120_s12, %s1121_s13  }
  0x2c   : > { %281 = sbr.rel (%p1181_p3) target bundleno = 1009 (0x3f1), region = 48 }
  0x31   : > { %1106 = dma.done.wait (%p977_p2), [#allocation3], 2048  }
  0x32   : > { %1108 = vsyncadd (%p977_p2), [#allocation3], 4294965248 }
  0x33   : > { %1110 = dma.done.wait (%p977_p2), [#allocation5], 4096  }
  0x34   : > { %1112 = vsyncadd (%p977_p2), [#allocation5], 4294963200  ;;  %p323_p6 = scmp.lt.s32.totalorder %s1176_s25, 1  ;;  %v1122_v0 = vmov 2   ;;  %v1123_v1 = vmov 0   ;;  %v1124_v2 = vmov 0.0   ;;  %v335_v39 = vlaneseq }
  0x35   : > { %1006 = vset.pattern.permute.xlu1 %v1122_v0  ;;  %1004 = vset.pattern.permute.xlu0 %v1123_v1  ;;  %v405_v4 = vld [vmem:[#allocation2 + $0x78] sm:$0xff]  ;;  %v404_v5 = vld [vmem:[#allocation2 + $0x70] sm:$0xff]  ;;  %v1125_v6 = vmov 3   ;;  %v1126_v7 = vmov 1   ;;  %v403_v8 = vld [vmem:[#allocation2 + $0x68] sm:$0xff]  ;;  %v1127_v10 = vmov 4  }
  0x36   : > { %s1346_s25 = smov (!%p323_p6, %s1176_s25), 1  ;;  %850 = vmatprep.subr.mxu0 %v1124_v2  ;;  %885 = vmatprep.subr.mxu1 %v1124_v2  ;;  %v402_v9 = vld [vmem:[#allocation2 + $0x60] sm:$0xff]  ;;  %v1128_v11 = vmov 5   ;;  %v401_v12 = vld [vmem:[#allocation2 + $0x58] sm:$0xff]  ;;  %v400_v14 = vld [vmem:[#allocation2 + $0x50] sm:$0xff]  ;;  %vm1129_vm0 = vmmov 0  }
  0x37   : > { %s1241_s22 = sshll.u32 %s1346_s25, 3  ;;  %851 = vmatpush3.msra.mxu0 %v405_v4  ;;  %v399_v15 = vld [vmem:[#allocation2 + $0x48] sm:$0xff]  ;;  %v398_v16 = vld [vmem:[#allocation2 + $0x40] sm:$0xff]  ;;  %882 = vmatprep.mubr.msk.f32.mxu0 %vm1129_vm0, %v1124_v2  ;;  %v397_v17 = vld [vmem:[#allocation2 + $0x38] sm:$0xff]  ;;  %v1286_v40 = vand.u32 127, %v335_v39  ;;  %vm681_vm11 = vcmask 64512  }
  0x38   : > { %s326_s27 = scalar_lea.vmem %s1335_s0, %s1241_s22  ;;  %852 = vmatprep.subr.mxu0 %v1124_v2  ;;  %s330_s29 = scalar_lea.vmem %s1336_s1, %s1241_s22  ;;  %v492_v18 = vld [vmem:[#allocation4 + $0x78] sm:$0xff]  ;;  %917 = vmatprep.mubr.msk.f32.mxu1 %vm1129_vm0, %v1124_v2  ;;  %v396_v19 = vld [vmem:[#allocation2 + $0x30] sm:$0xff]  ;;  %v395_v21 = vld [vmem:[#allocation2 + $0x28] sm:$0xff] }
  0x39   : > { %v337_v3 = vld [vmem:[%s326_s27] sm:$0xff]  ;;  %853 = vmatpush3.msra.mxu0 %v404_v5  ;;  %v491_v20 = vld [vmem:[#allocation4 + $0x70] sm:$0xff]  ;;  %886 = vmatpush3.msra.mxu1 %v492_v18  ;;  %v490_v22 = vld [vmem:[#allocation4 + $0x68] sm:$0xff]  ;;  %vm374_vm7 = vcmp.eq.s32.totalorder %v1286_v40, 72  ;;  %vm382_vm8 = vcmp.eq.s32.totalorder %v1286_v40, 73  ;;  %vm388_vm9 = vcmp.eq.s32.totalorder %v1286_v40, 74  ;;  %s334_s13 = scalar_lea.vmem %s1342_s7, %s1241_s22 }
  0x3a   : > { %350 = vperm.xlu1 %1006, %v337_v3   ;;  %339 = vperm.xlu0 %1004, %v337_v3   ;;  %v375_v13 = vld [vmem:[%s330_s29] sm:$0xff]  ;;  %v393_v25 = vld [vmem:[#allocation2 + $0x18] sm:$0xff]  ;;  %v392_v27 = vld [vmem:[#allocation2 + $0x10] sm:$0xff]  ;;  %vm675_vm10 = vcmp.lt.s32.totalorder %v1286_v40, 3 }
  0x3b   : > { %854 = vmatprep.subr.mxu0 %v1124_v2  ;;  %887 = vmatprep.subr.mxu1 %v1124_v2  ;;  %v394_v23 = vld [vmem:[#allocation2 + $0x20] sm:$0xff]  ;;  %v488_v26 = vld [vmem:[#allocation4 + $0x58] sm:$0xff]  ;;  %v487_v28 = vld [vmem:[#allocation4 + $0x50] sm:$0xff] }
  0x3c   : > { %855 = vmatpush3.msra.mxu0 %v403_v8  ;;  %888 = vmatpush3.msra.mxu1 %v491_v20  ;;  %v489_v24 = vld [vmem:[#allocation4 + $0x60] sm:$0xff]  ;;  %v391_v29 = vld [vmem:[#allocation2 + $0x8] sm:$0xff]  ;;  %v484_v33 = vld [vmem:[#allocation4 + $0x38] sm:$0xff] }
  0x3d   : > { %856 = vmatprep.subr.mxu0 %v1124_v2  ;;  %889 = vmatprep.subr.mxu1 %v1124_v2  ;;  %v486_v30 = vld [vmem:[#allocation4 + $0x48] sm:$0xff]  ;;  %v390_v31 = vld [vmem:[#allocation2] sm:$0xff]  ;;  %v483_v34 = vld [vmem:[#allocation4 + $0x30] sm:$0xff] }
  0x3e   : > { %1007 = vset.pattern.permute.xlu1 %v1125_v6  ;;  %1005 = vset.pattern.permute.xlu0 %v1126_v7  ;;  %v485_v32 = vld [vmem:[#allocation4 + $0x40] sm:$0xff]  ;;  %v482_v35 = vld [vmem:[#allocation4 + $0x28] sm:$0xff]  ;;  %v480_v37 = vld [vmem:[#allocation4 + $0x18] sm:$0xff] }
  0x3f   : > { %356 = vperm.xlu1 %1007, %v337_v3   ;;  %344 = vperm.xlu0 %1005, %v337_v3   ;;  %v481_v36 = vld [vmem:[#allocation4 + $0x20] sm:$0xff]  ;;  %v479_v38 = vld [vmem:[#allocation4 + $0x10] sm:$0xff]  ;;  %v478_v0 = vld [vmem:[#allocation4 + $0x8] sm:$0xff] }
  0x40   : > { %857 = vmatpush3.msra.mxu0 %v402_v9  ;;  %890 = vmatpush3.msra.mxu1 %v490_v22  ;;  %v591_v6 = vld [vmem:[#allocation6 + $0x78] sm:$0xff]  ;;  %v589_v8 = vld [vmem:[#allocation6 + $0x68] sm:$0xff]  ;;  %v588_v9 = vld [vmem:[#allocation6 + $0x60] sm:$0xff] }
  0x41   : > { %858 = vmatprep.subr.mxu0 %v1124_v2  ;;  %891 = vmatprep.subr.mxu1 %v1124_v2  ;;  %v579_v18 = vld [vmem:[#allocation6 + $0x18] sm:$0xff]  ;;  %v577_v20 = vld [vmem:[#allocation6 + $0x8] sm:$0xff]  ;;  %v793_v22 = vld [vmem:[%s1339_s4] ss:$0 sm:$0xff] }
  0x42   : > { %859 = vmatpush3.msra.mxu0 %v401_v12  ;;  %892 = vmatpush3.msra.mxu1 %v489_v24  ;;  %v585_v12 = vld [vmem:[#allocation6 + $0x48] sm:$0xff] }
  0x43   : > { %1008 = vset.pattern.permute.xlu1 %v1127_v10  ;;  %1009 = vset.pattern.permute.xlu0 %v1128_v11  ;;  %v587_v10 = vld [vmem:[#allocation6 + $0x58] sm:$0xff]  ;;  %v586_v11 = vld [vmem:[#allocation6 + $0x50] sm:$0xff] }
  0x44   : > { %362 = vperm.xlu1 %1008, %v337_v3   ;;  %368 = vperm.xlu0 %1009, %v337_v3  }
  0x45   : > { %860 = vmatprep.subr.mxu0 %v1124_v2  ;;  %893 = vmatprep.subr.mxu1 %v1124_v2 }
  0x46   : > { %861 = vmatpush3.msra.mxu0 %v400_v14  ;;  %894 = vmatpush3.msra.mxu1 %v488_v26  ;;  %v583_v14 = vld [vmem:[#allocation6 + $0x38] sm:$0xff] }
  0x47   : > { %862 = vmatprep.subr.mxu0 %v1124_v2  ;;  %895 = vmatprep.subr.mxu1 %v1124_v2 }
  0x48   : > { %1010 = vset.pattern.permute.xlu1 %v1123_v1  ;;  %1012 = vset.pattern.permute.xlu0 %v1126_v7 }
  0x49   : > { %378 = vperm.xlu1 %1010, %v375_v13   ;;  %863 = vmatpush3.msra.mxu0 %v399_v15  ;;  %v582_v15 = vld [vmem:[#allocation6 + $0x30] sm:$0xff] }
  0x4a   : > { %864 = vmatprep.subr.mxu0 %v1124_v2  ;;  %896 = vmatpush3.msra.mxu1 %v487_v28 }
  0x4b   : > { %865 = vmatpush3.msra.mxu0 %v398_v16  ;;  %897 = vmatprep.subr.mxu1 %v1124_v2  ;;  %v581_v16 = vld [vmem:[#allocation6 + $0x28] sm:$0xff] }
  0x4c   : > { %866 = vmatprep.subr.mxu0 %v1124_v2  ;;  %898 = vmatpush3.msra.mxu1 %v486_v30  ;;  %v795_v30 = vld [vmem:[%s1341_s6] ss:$0 sm:$0xff] }
  0x4d   : > { %1011 = vset.pattern.permute.xlu1 %v1126_v7  ;;  %867 = vmatpush3.msra.mxu0 %v397_v17  ;;  %v590_v7 = vld [vmem:[#allocation6 + $0x70] sm:$0xff]  ;;  %v580_v17 = vld [vmem:[#allocation6 + $0x20] sm:$0xff] }
  0x4e   : > { %384 = vperm.xlu1 %1011, %v375_v13   ;;  %868 = vmatprep.subr.mxu0 %v1124_v2  ;;  %v584_v13 = vld [vmem:[#allocation6 + $0x40] sm:$0xff] }
  0x4f   : > { %869 = vmatpush3.msra.mxu0 %v396_v19  ;;  %899 = vmatprep.subr.mxu1 %v1124_v2  ;;  %v578_v19 = vld [vmem:[#allocation6 + $0x10] sm:$0xff] }
  0x50   : > { %870 = vmatprep.subr.mxu0 %v1124_v2  ;;  %900 = vmatpush3.msra.mxu1 %v485_v32 }
  0x51   : > { %871 = vmatpush3.msra.mxu0 %v395_v21  ;;  %901 = vmatprep.subr.mxu1 %v1124_v2  ;;  %v576_v21 = vld [vmem:[#allocation6] sm:$0xff] }
  0x52   : > { %872 = vmatprep.subr.mxu0 %v1124_v2  ;;  %902 = vmatpush3.msra.mxu1 %v484_v33 }
  0x53   : > { %873 = vmatpush3.msra.mxu0 %v394_v23  ;;  %903 = vmatprep.subr.mxu1 %v1124_v2 }
  0x54   : > { %874 = vmatprep.subr.mxu0 %v1124_v2  ;;  %904 = vmatpush3.msra.mxu1 %v483_v34 }
  0x55   : > { %875 = vmatpush3.msra.mxu0 %v393_v25  ;;  %905 = vmatprep.subr.mxu1 %v1124_v2 }
  0x56   : > { %876 = vmatprep.subr.mxu0 %v1124_v2  ;;  %906 = vmatpush3.msra.mxu1 %v482_v35 }
  0x57   : > { %877 = vmatpush3.msra.mxu0 %v392_v27  ;;  %907 = vmatprep.subr.mxu1 %v1124_v2 }
  0x58   : > { %878 = vmatprep.subr.mxu0 %v1124_v2  ;;  %908 = vmatpush3.msra.mxu1 %v481_v36 }
  0x59   : > { %879 = vmatpush3.msra.mxu0 %v391_v29  ;;  %909 = vmatprep.subr.mxu1 %v1124_v2 }
  0x5a   : > { %880 = vmatprep.subr.mxu0 %v1124_v2  ;;  %910 = vmatpush3.msra.mxu1 %v480_v37 }
  0x5b   : > { %881 = vmatpush3.msra.mxu0 %v390_v31  ;;  %911 = vmatprep.subr.mxu1 %v1124_v2 }
  0x5c   : > { %920 = vmatprep.subr.mxu0 %v1124_v2  ;;  %912 = vmatpush3.msra.mxu1 %v479_v38 }
  0x5d   : > { %913 = vmatprep.subr.mxu1 %v1124_v2 }
  0x5e   : > { %914 = vmatpush3.msra.mxu1 %v478_v0 }
  0x5f   : > { %915 = vmatprep.subr.mxu1 %v1124_v2 }
  0xb5   : > { %v351_v41 = vpop.permute.xlu1 %350  ;;  %v340_v42 = vpop.permute.xlu0 %339 }
  0xb6   : > { %vm341_vm1 = vcmp.eq.s32.totalorder %v1286_v40, %v340_v42  ;;  %vm352_vm2 = vcmp.eq.s32.totalorder %v1286_v40, %v351_v41 }
  0xb7   : > { %v342_v45 = vsel %vm341_vm1, 1, %v1123_v1  ;;  %v353_v48 = vsel %vm352_vm2, 1, %v1123_v1 }
  0xba   : > { %v357_v43 = vpop.permute.xlu1 %356  ;;  %v345_v44 = vpop.permute.xlu0 %344 }
  0xbb   : > { %vm346_vm3 = vcmp.eq.s32.totalorder %v1286_v40, %v345_v44  ;;  %vm358_vm4 = vcmp.eq.s32.totalorder %v1286_v40, %v357_v43 }
  0xbc   : > { %v347_v46 = vsel %vm346_vm3, 1, %v1123_v1  ;;  %v359_v52 = vsel %vm358_vm4, 1, %v1123_v1 }
  0xbd   : > { %v348_v47 = vadd.s32 %v347_v46, %v342_v45 }
  0xbf   : > { %v354_v49 = vadd.s32 %v353_v48, %v348_v47  ;;  %v363_v50 = vpop.permute.xlu1 %362  ;;  %v369_v51 = vpop.permute.xlu0 %368 }
  0xc0   : > { %vm364_vm5 = vcmp.eq.s32.totalorder %v1286_v40, %v363_v50  ;;  %vm370_vm6 = vcmp.eq.s32.totalorder %v1286_v40, %v369_v51 }
  0xc1   : > { %v360_v53 = vadd.s32 %v359_v52, %v354_v49  ;;  %v365_v54 = vsel %vm364_vm5, 1, %v1123_v1  ;;  %v371_v55 = vsel %vm370_vm6, 1, %v1123_v1  ;;  %v477_v1 = vld [vmem:[#allocation4] sm:$0xff] }
  0xc2   : > { %916 = vmatpush3.msra.mxu1 %v477_v1 }
  0xc3   : > { %v366_v56 = vadd.s32 %v365_v54, %v360_v53 }
  0xc4   : > { %v379_v57 = vpop.permute.xlu1 %378 }
  0xc5   : > { %v372_v58 = vadd.s32 %v371_v55, %v366_v56 }
  0xc7   : > { %v373_v59 = vcvt.s32.f32 %v372_v58 }
  0xc9   : > { %v381_v60 = vsel %vm374_vm7, %v379_v57, %v373_v59  ;;  %v385_v61 = vpop.permute.xlu1 %384 }
  0xca   : > { %v387_v62 = vsel %vm382_vm8, %v385_v61, %v381_v60 }
  0xcb   : > { %v389_v63 = vsel %vm388_vm9, 1.0, %v387_v62 }
  0xcc   : > { %883 = vmatmul.mubr.f32.vlgmr.msra.gmra.mxu0 %v389_v63 }
  0xcd   : > { %952 = vmatprep.mubr.msk.f32.mxu0 %vm1129_vm0, %v1124_v2  ;;  %921 = vmatpush3.msra.mxu0 %v591_v6 }
  0xce   : > { %922 = vmatprep.subr.mxu0 %v1124_v2 }
  0xcf   : > { %923 = vmatpush3.msra.mxu0 %v590_v7 }
  0xd0   : > { %924 = vmatprep.subr.mxu0 %v1124_v2 }
  0xd1   : > { %925 = vmatpush3.msra.mxu0 %v589_v8 }
  0xd2   : > { %926 = vmatprep.subr.mxu0 %v1124_v2 }
  0xd3   : > { %927 = vmatpush3.msra.mxu0 %v588_v9 }
  0xd4   : > { %928 = vmatprep.subr.mxu0 %v1124_v2 }
  0xd5   : > { %929 = vmatpush3.msra.mxu0 %v587_v10 }
  0xd6   : > { %930 = vmatprep.subr.mxu0 %v1124_v2 }
  0xd7   : > { %931 = vmatpush3.msra.mxu0 %v586_v11 }
  0xd8   : > { %932 = vmatprep.subr.mxu0 %v1124_v2 }
  0xd9   : > { %933 = vmatpush3.msra.mxu0 %v585_v12 }
  0xda   : > { %934 = vmatprep.subr.mxu0 %v1124_v2 }
  0xdb   : > { %935 = vmatpush3.msra.mxu0 %v584_v13 }
  0xdc   : > { %936 = vmatprep.subr.mxu0 %v1124_v2 }
  0xdd   : > { %937 = vmatpush3.msra.mxu0 %v583_v14 }
  0xde   : > { %938 = vmatprep.subr.mxu0 %v1124_v2 }
  0xdf   : > { %939 = vmatpush3.msra.mxu0 %v582_v15 }
  0xe0   : > { %940 = vmatprep.subr.mxu0 %v1124_v2 }
  0xe1   : > { %941 = vmatpush3.msra.mxu0 %v581_v16 }
  0xe2   : > { %942 = vmatprep.subr.mxu0 %v1124_v2 }
  0xe3   : > { %943 = vmatpush3.msra.mxu0 %v580_v17 }
  0xe4   : > { %944 = vmatprep.subr.mxu0 %v1124_v2 }
  0xe5   : > { %945 = vmatpush3.msra.mxu0 %v579_v18 }
  0xe6   : > { %946 = vmatprep.subr.mxu0 %v1124_v2 }
  0xe7   : > { %947 = vmatpush3.msra.mxu0 %v578_v19 }
  0xe8   : > { %948 = vmatprep.subr.mxu0 %v1124_v2 }
  0xe9   : > { %949 = vmatpush3.msra.mxu0 %v577_v20 }
  0xea   : > { %950 = vmatprep.subr.mxu0 %v1124_v2 }
  0xeb   : > { %951 = vmatpush3.msra.mxu0 %v576_v21 }
 0x18c   : > { %v472_v3 = vpop.f32.mrf.mxu0 }
 0x18d   : > { %v476_v4 = vmax.f32 %v472_v3, 0.0 }
 0x18e   : > { %v884_v5 = vpop.f32.mrf.mxu0 }
 0x18f   : > { %918 = vmatmul.mubr.f32.vlgmr.msra.gmra.mxu1 %v476_v4 }
 0x24f   : > { %v566_v23 = vpop.f32.mrf.mxu1 }
 0x250   : > { %v567_v24 = vadd.f32 %v793_v22, %v566_v23 }
 0x251   : > { %v919_v25 = vpop.f32.mrf.mxu1 }
 0x252   : > { %v794_v26 = vmul.f32 -1.442695, %v567_v24 }
 0x254   : > { %1013 = vpow2.f32 %v794_v26 }
 0x261   : > { %v1014_v27 = vpop.eup %1013 }
 0x262   : > { %v573_v28 = vadd.f32 1.0, %v1014_v27 }
 0x264   : > { %1015 = vrcp.f32 %v573_v28 }
 0x271   : > { %v1016_v29 = vpop.eup %1015 }
 0x272   : > { %953 = vmatmul.mubr.f32.vlgmr.msra.gmra.mxu0 %v1016_v29 }
 0x332   : > { %v665_v2 = vpop.f32.mrf.mxu0 }
 0x333   : > { %v666_v31 = vadd.f32 %v795_v30, %v665_v2 }
 0x334   : > { %v954_v32 = vpop.f32.mrf.mxu0 }
 0x335   : > { %v796_v33 = vmul.f32 -1.442695, %v666_v31 }
 0x337   : > { %1017 = vpow2.f32 %v796_v33 }
 0x344   : > { %v1018_v34 = vpop.eup %1017 }
 0x345   : > { %v672_v35 = vadd.f32 1.0, %v1018_v34 }
 0x347   : > { %1019 = vrcp.f32 %v672_v35 }
 0x354   : > { %v1020_v36 = vpop.eup %1019 }
 0x355   : > { %v676_v37 = vsel %vm675_vm10, %v1020_v36, 0.0 }
 0x356   : > { %677 = vadd.xlane.f32.xlu0 %v676_v37 }
 0x3df   : > { %v678_v38 = vpop.xlane.xlu0 %677 }
 0x3e0   : > { %1021 = vrcp.f32 %v678_v38 }
 0x3ed   : > { %v1022_v39 = vpop.eup %1021 }
 0x3ee   : > { %v680_v41 = vmul.f32 %v1022_v39, %v1020_v36 }
 0x3f0   : > { %682 = vst.msk [vmem:[%s334_s13] sm:$0xff] %vm681_vm11, %v680_v41 }
 0x3f1 PF: > { %s19_s24 = sadd.s32 1, %s1115_s24  }
 0x3f2   : > { %p16_p2 = scmp.ge.s32.totalorder %s19_s24, 4  }
 0x3f4   :  { %18 = sbr.rel (!%p16_p2) target bundleno = 2 (0x2), region = 94 }
 0x3f9   :  { %702 = vsyncpa [#allocation3], 1 }
 0x3fa   :  { %704 = vsyncpa [#allocation3 + $0x1], 1 }
 0x3fb   :  { %705 = vsyncpa [#allocation5], 1 }

</bundles_post_ra>
